<compile_context>
chip_gen: v7x
topology: tpu7x:2x2x1
jax: 0.10.0
libtpu: 0.0.40
codegen_flags: <defaults>
</compile_context>

<pallas_src>
import jax
import jax.numpy as jnp
import numpy as np
from jax.experimental import pallas as pl
from jax.experimental.pallas import tpu as pltpu


def attention_kernel(hi_ref, ht_ref, w1_hi_ref, w1_ht_ref, b1_ref, uw_ref, out_ref):
    hi = hi_ref[...]            # (B, T, D)
    ht = ht_ref[...]            # (B, T2, D)
    B, T, D = hi.shape
    A = w1_hi_ref.shape[-1]

    # mean over ht's sequence axis -> (B, D)
    ht_mean = jnp.mean(ht, axis=1)

    # hi half of linear_1: fold batch into M for one MXU matmul
    hi_flat = hi.reshape(B * T, D)                                   # (B*T, D)
    pre_hi = jnp.dot(hi_flat, w1_hi_ref[...],
                     preferred_element_type=jnp.float32)             # (B*T, A)
    pre_hi = pre_hi.reshape(B, T, A)

    # ht half: computed once per batch row, broadcast over T via addition
    pre_ht = jnp.dot(ht_mean, w1_ht_ref[...],
                     preferred_element_type=jnp.float32)             # (B, A)

    # bias + tanh (EUP)
    pre = pre_hi + pre_ht[:, None, :] + b1_ref[...]                  # (B, T, A)
    h = jnp.tanh(pre)

    # attention scores u(h): rank-1 contraction -> VPU multiply + lane reduce
    u = uw_ref[...][:, 0]                                            # (A,)
    logits = jnp.sum(h * u, axis=-1)                                 # (B, T)

    # softmax over the sequence axis (dim=1)
    m = jnp.max(logits, axis=1, keepdims=True)
    e = jnp.exp(logits - m)
    denom = jnp.sum(e, axis=1, keepdims=True)
    attn = e * pl.reciprocal(denom, approx=True)                     # (B, T)

    # weighted sum of hi over the sequence axis (VPU multiply + reduce)
    s = jnp.sum(attn[..., None] * hi, axis=1)                        # (B, D)
    out_ref[...] = s.astype(out_ref.dtype)


def attention_forward(hi, ht, w1, b1, uw):
    B, T, D = hi.shape
    # Split linear_1's weight: first D rows act on hi, last D rows on mean(ht).
    w1_hi = w1[:D, :]
    w1_ht = w1[D:, :]
    return pl.pallas_call(
        attention_kernel,
        out_shape=jax.ShapeDtypeStruct((B, D), hi.dtype),
        in_specs=[
            pl.BlockSpec(memory_space=pltpu.VMEM),
            pl.BlockSpec(memory_space=pltpu.VMEM),
            pl.BlockSpec(memory_space=pltpu.VMEM),
            pl.BlockSpec(memory_space=pltpu.VMEM),
            pl.BlockSpec(memory_space=pltpu.VMEM),
            pl.BlockSpec(memory_space=pltpu.VMEM),
        ],
        out_specs=pl.BlockSpec(memory_space=pltpu.VMEM),
    )(hi, ht, w1_hi, w1_ht, b1, uw)


def attention_ref(hi, ht, w1, b1, uw):
    # pure-JAX reference mirroring the PyTorch forward
    ht_m = jnp.mean(ht, axis=1, keepdims=True)
    ht_rep = jnp.broadcast_to(ht_m, hi.shape)
    h = jnp.concatenate([hi, ht_rep], axis=2)
    h = jnp.tanh(h @ w1 + b1)
    u = (h @ uw)[..., 0]
    a = jax.nn.softmax(u, axis=1)
    return jnp.sum(a[..., None] * hi, axis=1)


if __name__ == "__main__":
    # config: hidden_dim=8 -> hi/ht feature dim = 2*hidden_dim = 16,
    #         linear_1 input = 4*hidden_dim = 32, attention_size = 32
    hidden_dim = 8
    attention_size = 32
    B, T, T2 = 2, 8, 8
    D = 2 * hidden_dim

    key = jax.random.PRNGKey(0)
    k_hi, k_ht, k_w1, k_b1, k_uw = jax.random.split(key, 5)

    hi = jax.random.normal(k_hi, (B, T, D), dtype=jnp.float32)
    ht = jax.random.normal(k_ht, (B, T2, D), dtype=jnp.float32)

    # deterministic parameter init (nn.Linear-style uniform bounds)
    bound1 = 1.0 / np.sqrt(4 * hidden_dim)
    w1 = jax.random.uniform(k_w1, (4 * hidden_dim, attention_size),
                            minval=-bound1, maxval=bound1, dtype=jnp.float32)
    b1 = jax.random.uniform(k_b1, (1, attention_size),
                            minval=-bound1, maxval=bound1, dtype=jnp.float32)
    bound_u = 1.0 / np.sqrt(attention_size)
    uw = jax.random.uniform(k_uw, (attention_size, 1),
                            minval=-bound_u, maxval=bound_u, dtype=jnp.float32)

    out = attention_forward(hi, ht, w1, b1, uw)
    jax.block_until_ready(out)

    ref = attention_ref(hi, ht, w1, b1, uw)
    assert out.shape == (B, D)
    # tolerance loosened slightly for the approx (EUP) reciprocal in the softmax
    assert np.allclose(np.asarray(out), np.asarray(ref), atol=2e-3, rtol=2e-3)

    print("KERNEL_OK")
</pallas_src>

<mosaic_0001>
module attributes {stable_mosaic.version = 11 : i64} {
  func.func @attention_kernel(%arg0: memref<2x8x16xf32, #tpu.memory_space<vmem>>, %arg1: memref<2x8x16xf32, #tpu.memory_space<vmem>>, %arg2: memref<16x32xf32, #tpu.memory_space<vmem>>, %arg3: memref<16x32xf32, #tpu.memory_space<vmem>>, %arg4: memref<1x32xf32, #tpu.memory_space<vmem>>, %arg5: memref<32x1xf32, #tpu.memory_space<vmem>>, %arg6: memref<2x16xf32, #tpu.memory_space<vmem>>) attributes {dimension_semantics = [], scalar_prefetch = 0 : i64, scratch_operands = 0 : i64, tpu.core_type = #tpu.core_type<tc>} {
    %c0 = arith.constant 0 : index
    %c0_0 = arith.constant 0 : index
    %c0_1 = arith.constant 0 : index
    %0 = vector.load %arg0[%c0, %c0_0, %c0_1] : memref<2x8x16xf32, #tpu.memory_space<vmem>>, vector<2x8x16xf32>
    %c0_2 = arith.constant 0 : index
    %c0_3 = arith.constant 0 : index
    %c0_4 = arith.constant 0 : index
    %1 = vector.load %arg1[%c0_2, %c0_3, %c0_4] : memref<2x8x16xf32, #tpu.memory_space<vmem>>, vector<2x8x16xf32>
    %cst = arith.constant dense<0.000000e+00> : vector<2x16xf32>
    %2 = vector.multi_reduction <add>, %1, %cst [1] : vector<2x8x16xf32> to vector<2x16xf32>
    %cst_5 = arith.constant 8.000000e+00 : f32
    %3 = vector.broadcast %cst_5 : f32 to vector<2x16xf32>
    %4 = arith.divf %2, %3 : vector<2x16xf32>
    %5 = vector.shape_cast %0 : vector<2x8x16xf32> to vector<16x16xf32>
    %c0_6 = arith.constant 0 : index
    %c0_7 = arith.constant 0 : index
    %6 = vector.load %arg2[%c0_6, %c0_7] : memref<16x32xf32, #tpu.memory_space<vmem>>, vector<16x32xf32>
    %cst_8 = arith.constant dense<0.000000e+00> : vector<16x32xf32>
    %7 = tpu.matmul %5, %6, %cst_8 {dimension_numbers = #tpu.dot_dimension_numbers<[1], [0], [0], [1], [0, 0, 1, 1], [], []>} : vector<16x16xf32>, vector<16x32xf32>, vector<16x32xf32> -> vector<16x32xf32>
    %8 = vector.shape_cast %7 : vector<16x32xf32> to vector<2x8x32xf32>
    %c0_9 = arith.constant 0 : index
    %c0_10 = arith.constant 0 : index
    %9 = vector.load %arg3[%c0_9, %c0_10] : memref<16x32xf32, #tpu.memory_space<vmem>>, vector<16x32xf32>
    %cst_11 = arith.constant dense<0.000000e+00> : vector<2x32xf32>
    %10 = tpu.matmul %4, %9, %cst_11 {dimension_numbers = #tpu.dot_dimension_numbers<[1], [0], [0], [1], [0, 0, 1, 1], [], []>} : vector<2x16xf32>, vector<16x32xf32>, vector<2x32xf32> -> vector<2x32xf32>
    %11 = vector.shape_cast %10 : vector<2x32xf32> to vector<2x1x32xf32>
    %12 = vector.broadcast %11 : vector<2x1x32xf32> to vector<2x8x32xf32>
    %13 = arith.addf %8, %12 : vector<2x8x32xf32>
    %c0_12 = arith.constant 0 : index
    %c0_13 = arith.constant 0 : index
    %14 = vector.load %arg4[%c0_12, %c0_13] : memref<1x32xf32, #tpu.memory_space<vmem>>, vector<1x32xf32>
    %15 = vector.shape_cast %14 : vector<1x32xf32> to vector<1x1x32xf32>
    %16 = vector.broadcast %15 : vector<1x1x32xf32> to vector<2x8x32xf32>
    %17 = arith.addf %13, %16 : vector<2x8x32xf32>
    %18 = math.tanh %17 : vector<2x8x32xf32>
    %c0_14 = arith.constant 0 : index
    %c0_15 = arith.constant 0 : index
    %19 = vector.load %arg5[%c0_14, %c0_15] : memref<32x1xf32, #tpu.memory_space<vmem>>, vector<32x1xf32>
    %20 = vector.shape_cast %19 : vector<32x1xf32> to vector<32xf32>
    %21 = vector.shape_cast %20 : vector<32xf32> to vector<1x1x32xf32>
    %22 = vector.broadcast %21 : vector<1x1x32xf32> to vector<2x8x32xf32>
    %23 = arith.mulf %18, %22 : vector<2x8x32xf32>
    %cst_16 = arith.constant dense<0.000000e+00> : vector<2x8xf32>
    %24 = vector.multi_reduction <add>, %23, %cst_16 [2] : vector<2x8x32xf32> to vector<2x8xf32>
    %cst_17 = arith.constant dense<0xFF800000> : vector<2xf32>
    %25 = vector.multi_reduction <maximumf>, %24, %cst_17 [1] : vector<2x8xf32> to vector<2xf32>
    %26 = vector.shape_cast %25 : vector<2xf32> to vector<2x1xf32>
    %27 = vector.broadcast %26 : vector<2x1xf32> to vector<2x8xf32>
    %28 = arith.subf %24, %27 : vector<2x8xf32>
    %29 = math.exp %28 : vector<2x8xf32>
    %cst_18 = arith.constant dense<0.000000e+00> : vector<2xf32>
    %30 = vector.multi_reduction <add>, %29, %cst_18 [1] : vector<2x8xf32> to vector<2xf32>
    %31 = vector.shape_cast %30 : vector<2xf32> to vector<2x1xf32>
    %32 = tpu.reciprocal %31 {approx = true} : vector<2x1xf32> -> vector<2x1xf32>
    %33 = vector.broadcast %32 : vector<2x1xf32> to vector<2x8xf32>
    %34 = arith.mulf %29, %33 : vector<2x8xf32>
    %35 = vector.shape_cast %34 : vector<2x8xf32> to vector<2x8x1xf32>
    %36 = vector.broadcast %35 : vector<2x8x1xf32> to vector<2x8x16xf32>
    %37 = arith.mulf %36, %0 : vector<2x8x16xf32>
    %cst_19 = arith.constant dense<0.000000e+00> : vector<2x16xf32>
    %38 = vector.multi_reduction <add>, %37, %cst_19 [1] : vector<2x8x16xf32> to vector<2x16xf32>
    %c0_20 = arith.constant 0 : index
    %c0_21 = arith.constant 0 : index
    %39 = vector.load %arg6[%c0_20, %c0_21] : memref<2x16xf32, #tpu.memory_space<vmem>>, vector<2x16xf32>
    tpu.vector_store %arg6[%c0_20, %c0_21], %38 {strides = array<i32>} : memref<2x16xf32, #tpu.memory_space<vmem>>, vector<2x16xf32>,
    return
  }
}

</mosaic_0001>

<bundles_post_ra>
// kernel: tpu_custom_call.1
= control target key start
LH: loop header
LB: loop body
LE: loop exit
PB: predicated region body
PF: predicated region fallthrough
CT: control target
= control target key end

     0   :  { %11 = vsyncpa [#allocation3], 0  ;;  %s736_s0 = inlined_call_operand.vmem [shape: f32[2,8,16], index: 0, kind: input, shape index: {}]   ;;  %s737_s1 = inlined_call_operand.vmem [shape: f32[2,8,16], index: 1, kind: input, shape index: {}]   ;;  %s738_s2 = inlined_call_operand.hbm [shape: f32[16,32], index: 2, kind: input, shape index: {}]   ;;  %s739_s3 = inlined_call_operand.hbm [shape: f32[16,32], index: 3, kind: input, shape index: {}]   ;;  %s740_s4 = inlined_call_operand.vmem [shape: f32[1,32], index: 4, kind: input, shape index: {}]   ;;  %s741_s5 = inlined_call_operand.vmem [shape: f32[32,1], index: 5, kind: input, shape index: {}]   ;;  %s742_s6 = inlined_call_operand.hbm [shape: f32[2,16], index: 6, kind: output, shape index: {}]  }
   0x1   :  { %12 = vsyncpa [#allocation6], 0 }
   0x2   :  { %13 = vsyncpa [#allocation4], 0  ;;  %s592_s21 = smov [#allocation2]   ;;  %s520_s25 = scalar_lea.hbm %s738_s2, 256 }
   0x3   :  { %s23_s22 = sshll.u32 %s592_s21, 4  ;;  %p521_p0 = scmp.ne.s32.totalorder %s738_s2, %s520_s25  ;;  %s24_s22 = int_to_ptr.vmem [resolvable:$true] %s23_s22 }
   0x4   :  { %p524_p1 = scmp.lt.u32.totalorder %s520_s25, %s738_s2 }
   0x6   :  { %p526_p2 = pnand %p524_p1, %p521_p0 }
   0x8   :  { %529 = shalt.err (!%p526_p2)
}
   0x9   :  { %s530_s30 = scalar_lea.vmem %s24_s22, 256  ;;  %p535_p4 = scmp.lt.s32.totalorder %s24_s22, %s24_s22 }
   0xa   :  { %p531_p3 = scmp.ne.s32.totalorder %s24_s22, %s530_s30  ;;  %p536_p5 = scmp.lt.s32.totalorder %s530_s30, %s530_s30 }
   0xc   :  { %p537_p6 = por %p536_p5, %p535_p4 }
   0xe   :  { %p538_p7 = pnand %p537_p6, %p531_p3 }
  0x10   :  { %541 = shalt.err (!%p538_p7)
}
  0x11   :  { %s593_s7 = smov 128   ;;  %s594_s8 = smov 8  }
  0x12   :  { %29 = dma.hbm_to_vmem [thread:$0]  %s738_s2, 256, %s24_s22, [#allocation3], %s593_s7, %s593_s7, %s594_s8  }
  0x13   :  { %s595_s11 = smov [#allocation5]   ;;  %s542_s15 = scalar_lea.hbm %s739_s3, 256 }
  0x14   :  { %s35_s12 = sshll.u32 %s595_s11, 4  ;;  %p543_p8 = scmp.ne.s32.totalorder %s739_s3, %s542_s15  ;;  %s36_s12 = int_to_ptr.vmem [resolvable:$true] %s35_s12 }
  0x15   :  { %p546_p9 = scmp.lt.u32.totalorder %s542_s15, %s739_s3 }
  0x17   :  { %p548_p10 = pnand %p546_p9, %p543_p8 }
  0x19   :  { %551 = shalt.err (!%p548_p10)
}
  0x1a   :  { %s552_s20 = scalar_lea.vmem %s36_s12, 256  ;;  %p557_p12 = scmp.lt.s32.totalorder %s36_s12, %s36_s12 }
  0x1b   :  { %p553_p11 = scmp.ne.s32.totalorder %s36_s12, %s552_s20  ;;  %p558_p13 = scmp.lt.s32.totalorder %s552_s20, %s552_s20 }
  0x1d   :  { %p559_p0 = por %p558_p13, %p557_p12 }
  0x1f   :  { %p560_p1 = pnand %p559_p0, %p553_p11 }
  0x21   :  { %563 = shalt.err (!%p560_p1)
}
  0x22   :  { %41 = dma.hbm_to_vmem [thread:$0]  %s739_s3, 256, %s36_s12, [#allocation6], %s593_s7, %s593_s7, %s594_s8  }
  0x23   :  { %586 = dma.done.wait [#allocation3], 256  }
  0x24   :  { %587 = vsyncadd [#allocation3], 4294967040 }
  0x25   :  { %588 = dma.done.wait [#allocation6], 256  }
  0x26   :  { %589 = vsyncadd [#allocation6], 4294967040  ;;  %v596_v0 = vmov 0.0|0.0   ;;  %vm597_vm0 = vmmov 0   ;;  %v598_v1 = vmov 0.0   ;;  %v599_v2 = vmov 0  }
  0x27   :  { %495 = vmatprep.subr.bf16.mxu1 %v596_v0  ;;  %488 = vmatprep.mubr.msk.f32.mxu1 %vm597_vm0, %v598_v1  ;;  %vm56_vm1 = vcmask 130048   ;;  %v157_v3 = vld [vmem:[#allocation5] sm:$0xff]  ;;  %v158_v4 = vld [vmem:[#allocation5 + $0x8] sm:$0xff]  ;;  %v54_v5 = vld [vmem:[%s737_s1] sm:$0xff]  ;;  %vm161_vm2 = vcmask 1041409   ;;  %v239_v36 = vlaneseq  ;;  %vm312_vm3 = vcmask 130112  }
  0x28   :  { %508 = vset.pattern.permute.xlu0 %v599_v2  ;;  %509 = vset.pattern.permute.xlu1 %v599_v2  ;;  %v496_v6 = vpack.c.bf16 %v158_v4, %v157_v3  ;;  %v55_v7 = vld [vmem:[%s737_s1 + $0x8] sm:$0xff]  ;;  %v57_v8 = vsel %vm56_vm1, %v54_v5, 0.0  ;;  %v74_v9 = vld [vmem:[#allocation2] sm:$0xff]  ;;  %v283_v17 = vld [vmem:[%s741_s5 + $0x10] sm:$0xff]  ;;  %v600_v34 = vmov 1966171168  }
  0x29   :  { %v75_v10 = vld [vmem:[#allocation2 + $0x8] sm:$0xff]  ;;  %v58_v11 = vrot.slane %v57_v8, 4  ;;  %v64_v12 = vsel %vm56_vm1, %v55_v7, 0.0  ;;  %v672_v14 = vld [vmem:[%s736_s0] sm:$0xff]  ;;  %296 = vperm.xlu1 %509, %v283_v17   ;;  %v284_v23 = vld [vmem:[%s741_s5 + $0x18] sm:$0xff]  ;;  %v237_v35 = vunpack.c.l.s4 %v600_v34  ;;  %v697_v40 = vshrl.u32 %v239_v36, 7 }
  0x2a   :  { %v491_v13 = vpack.c.bf16 %v75_v10, %v74_v9  ;;  %v281_v15 = vld [vmem:[%s741_s5] sm:$0xff]  ;;  %497 = vmatpush3.bf16.msra.mxu1 %v496_v6  ;;  %v65_v16 = vrot.slane %v64_v12, 4  ;;  %481 = vmatprep.mubr.msk.f32.mxu0 %vm56_vm1, %v672_v14  ;;  %v685_v20 = vld [vmem:[%s736_s0 + $0x8] sm:$0xff]  ;;  %v302_v42 = vand.u32 127, %v239_v36  ;;  %vm319_vm4 = vcmask 195712  }
  0x2b   :  { %v59_v18 = vadd.f32 %v58_v11, %v57_v8  ;;  %290 = vperm.xlu0 %508, %v281_v15   ;;  %v282_v21 = vld [vmem:[%s741_s5 + $0x8] sm:$0xff]  ;;  %v238_v39 = vunpack.c.0.s8 %v237_v35  ;;  %v701_v46 = vsub.s32 0, %v697_v40  ;;  %v469_v53 = vld [vmem:[%s740_s4] ss:$0 sm:$0xff]  ;;  %vm326_vm5 = vcmask 261312   ;;  %s601_s4 = smov [#allocation7]  }
  0x2c   :  { %492 = vmatprep.subr.bf16.mxu0 %v491_v13  ;;  %v66_v19 = vadd.f32 %v65_v16, %v64_v12  ;;  %v307_v50 = vadd.s32 4294967288, %v302_v42  ;;  %v314_v54 = vadd.s32 4294967280, %v302_v42  ;;  %v305_v57 = vsub.s32 %v302_v42, %v697_v40  ;;  %s456_s12 = sshll.u32 %s601_s4, 4  ;;  %s457_s12 = int_to_ptr.vmem [resolvable:$true] %s456_s12 }
  0x2d   :  { %494 = vmatpush3.bf16.msra.mxu0 %v491_v13  ;;  %v60_v22 = vrot.slane %v59_v18, 2  ;;  %299 = vperm.xlu1 %509, %v284_v23   ;;  %v241_v41 = vsub.s32 %v238_v39, %v697_v40  ;;  %v321_v63 = vadd.s32 4294967272, %v302_v42  ;;  %vm343_vm6 = vcmask 261120   ;;  %s564_s13 = scalar_lea.vmem %s457_s12, 32  ;;  %p569_p3 = scmp.lt.s32.totalorder %s457_s12, %s457_s12 }
  0x2e   :  { %v67_v24 = vrot.slane %v66_v19, 2  ;;  %v310_v58 = vsub.s32 %v307_v50, %v697_v40  ;;  %v317_v0 = vsub.s32 %v314_v54, %v697_v40  ;;  %vm362_vm7 = vcmask 58368   ;;  %p565_p2 = scmp.ne.s32.totalorder %s457_s12, %s564_s13  ;;  %p570_p4 = scmp.lt.s32.totalorder %s564_s13, %s564_s13 }
  0x2f   :  { %v61_v25 = vadd.f32 %v60_v22, %v59_v18  ;;  %293 = vperm.xlu0 %508, %v282_v21   ;;  %v324_v4 = vsub.s32 %v321_v63, %v697_v40  ;;  %vm448_vm8 = vcmask 123904  }
  0x30   :  { %482 = vmatmul.mubr.msk.f32.vlgmr.msra.gmra.mrb[0].mxu0 %vm56_vm1, %v685_v20  ;;  %v68_v26 = vadd.f32 %v67_v24, %v66_v19  ;;  %p571_p5 = por %p570_p4, %p569_p3 }
  0x31   :  { %v62_v27 = vrot.slane %v61_v25, 1 }
  0x32   :  { %v69_v28 = vrot.slane %v68_v26, 1  ;;  %p572_p6 = pnand %p571_p5, %p565_p2 }
  0x33   :  { %v63_v29 = vadd.f32 %v62_v27, %v61_v25  ;;  %v373_v25 = vsub.s32 1, %v697_v40 }
  0x34   :  { %v70_v30 = vadd.f32 %v69_v28, %v68_v26 }
  0x35   :  { %v72_v31 = vmul.f32 0.125, %v63_v29 }
  0x36   :  { %v73_v32 = vmul.f32 0.125, %v70_v30 }
  0x38   :  { %v162_v33 = vsel %vm161_vm2, %v73_v32, %v72_v31 }
  0x39   :  { %489 = vmatmul.mubr.msk.f32.vlgmr.msra.gmra.mrb[0].mxu1 %vm56_vm1, %v162_v33 }
  0xa8   :  { %v297_v59 = vpop.permute.xlu1 %296 }
  0xa9   :  { %v318_v5 = vrot.slane %v297_v59, %v317_v0 }
  0xaa   :  { %v291_v47 = vpop.permute.xlu0 %290 }
  0xab   :  { %v306_v2 = vrot.slane %v291_v47, %v305_v57 }
  0xac   :  { %v300_v6 = vpop.permute.xlu1 %299 }
  0xad   :  { %v325_v8 = vrot.slane %v300_v6, %v324_v4 }
  0xae   :  { %v294_v60 = vpop.permute.xlu0 %293 }
  0xaf   :  { %v311_v3 = vrot.slane %v294_v60, %v310_v58 }
  0xb1   :  { %v313_v7 = vsel %vm312_vm3, %v311_v3, %v306_v2 }
  0xb2   :  { %v320_v9 = vsel %vm319_vm4, %v318_v5, %v313_v7 }
  0xb3   :  { %v327_v11 = vsel %vm326_vm5, %v325_v8, %v320_v9 }
 0x103   :  { %v483_v37 = vpop.f32.mrb[0].mxu0 }
 0x104   :  { %v148_v38 = vpop.f32.mrb[1].mxu0 }
 0x10c   :  { %v231_v43 = vpop.f32.mrb[0].mxu1 }
 0x10d   :  { %v242_v44 = vrot.slane %v231_v43, %v241_v41  ;;  %v490_v45 = vpop.f32.mrb[1].mxu1 }
 0x10f   :  { %v243_v48 = vcombine.high %v242_v44, %v242_v44  ;;  %v250_v49 = vrot.slane %v242_v44, %v241_v41 }
 0x111   :  { %v257_v51 = vrot.slane %v243_v48, %v241_v41  ;;  %v261_v52 = vrot.slane %v250_v49, %v701_v46 }
 0x113   :  { %v265_v55 = vrot.slane %v257_v51, %v701_v46  ;;  %v268_v56 = vadd.f32 %v261_v52, %v148_v38 }
 0x115   :  { %v269_v61 = vadd.f32 %v483_v37, %v265_v55  ;;  %v277_v62 = vadd.f32 %v469_v53, %v268_v56 }
 0x117   :  { %v278_v1 = vadd.f32 %v469_v53, %v269_v61  ;;  %510 = vtanh.f32 %v277_v62 }
 0x119   :  { %512 = vtanh.f32 %v278_v1 }
 0x121   :  { %v511_v10 = vpop.eup %510 }
 0x122   :  { %v341_v12 = vmul.f32 %v511_v10, %v327_v11 }
 0x123   :  { %v513_v13 = vpop.eup %512 }
 0x124   :  { %v344_v15 = vsel %vm343_vm6, %v341_v12, 0.0  ;;  %v342_v16 = vmul.f32 %v513_v13, %v327_v11 }
 0x125   :  { %345 = vadd.xlane.f32.xlu0 %v344_v15 }
 0x126   :  { %v347_v17 = vsel %vm343_vm6, %v342_v16, 0.0 }
 0x127   :  { %348 = vadd.xlane.f32.xlu1 %v347_v17 }
 0x1b2   :  { %v346_v18 = vpop.xlane.xlu0 %345 }
 0x1b3   :  { %v355_v21 = vrot.slane %v346_v18, %v305_v57 }
 0x1b4   :  { %v349_v19 = vpop.xlane.xlu1 %348 }
 0x1b5   :  { %v359_v22 = vrot.slane %v349_v19, %v305_v57 }
 0x1b7   :  { %v360_v23 = vsel %vm161_vm2, %v359_v22, %v355_v21 }
 0x1b8   :  { %v363_v24 = vsel %vm362_vm7, %v360_v23, -inf }
 0x1b9   :  { %364 = vmax.xlane.f32.xlu0 %v363_v24 }
 0x246   :  { %v365_v26 = vpop.xlane.xlu0 %364 }
 0x247   :  { %v370_v27 = vrot.slane %v365_v26, %v701_v46  ;;  %v374_v28 = vrot.slane %v365_v26, %v373_v25 }
 0x249   :  { %v377_v29 = vsub.f32 %v346_v18, %v370_v27  ;;  %v378_v30 = vsub.f32 %v349_v19, %v374_v28 }
 0x24b   :  { %v379_v31 = vmul.f32 1.442695, %v377_v29  ;;  %v381_v32 = vmul.f32 1.442695, %v378_v30 }
 0x24d   :  { %514 = vpow2.f32 %v379_v31 }
 0x24e   :  { %516 = vpow2.f32 %v381_v32 }
 0x257   :  { %v515_v33 = vpop.eup %514 }
 0x258   :  { %v517_v34 = vpop.eup %516  ;;  %386 = vperm.xlu0 %508, %v515_v33  }
 0x259   :  { %389 = vperm.xlu1 %509, %v517_v34  }
 0x2d7   :  { %v387_v35 = vpop.permute.xlu0 %386 }
 0x2d8   :  { %v390_v36 = vpop.permute.xlu1 %389  ;;  %v394_v37 = vrot.slane %v387_v35, %v305_v57 }
 0x2d9   :  { %v398_v38 = vrot.slane %v390_v36, %v305_v57 }
 0x2db   :  { %v399_v39 = vsel %vm161_vm2, %v398_v38, %v394_v37 }
 0x2dc   :  { %v401_v40 = vsel %vm362_vm7, %v399_v39, 0.0 }
 0x2dd   :  { %402 = vadd.xlane.f32.xlu1 %v401_v40 }
 0x36a   :  { %v403_v41 = vpop.xlane.xlu1 %402 }
 0x36b   :  { %518 = vrcp.f32 %v403_v41 }
 0x375   :  { %v519_v42 = vpop.eup %518 }
 0x376   :  { %v409_v43 = vrot.slane %v519_v42, %v701_v46  ;;  %v413_v45 = vrot.slane %v519_v42, %v373_v25 }
 0x378   :  { %v416_v44 = vmul.f32 %v515_v33, %v409_v43  ;;  %v417_v47 = vmul.f32 %v517_v34, %v413_v45 }
 0x37a   :  { %420 = vperm.xlu0 %508, %v416_v44  }
 0x37e   :  { %425 = vperm.xlu0 %508, %v417_v47  }
 0x3f9   :  { %v421_v48 = vpop.permute.xlu0 %420 }
 0x3fa   :  { %v428_v49 = vmul.f32 %v421_v48, %v672_v14 }
 0x3fc   :  { %v430_v50 = vsel %vm56_vm1, %v428_v49, 0.0 }
 0x3fd   :  { %v431_v51 = vrot.slane %v430_v50, 4  ;;  %v426_v52 = vpop.permute.xlu0 %425 }
 0x3fe   :  { %v429_v53 = vmul.f32 %v426_v52, %v685_v20 }
 0x3ff   :  { %v432_v54 = vadd.f32 %v431_v51, %v430_v50 }
 0x400   :  { %v437_v55 = vsel %vm56_vm1, %v429_v53, 0.0 }
 0x401   :  { %v433_v56 = vrot.slane %v432_v54, 2  ;;  %v438_v57 = vrot.slane %v437_v55, 4 }
 0x403   :  { %v434_v46 = vadd.f32 %v433_v56, %v432_v54  ;;  %v439_v58 = vadd.f32 %v438_v57, %v437_v55 }
 0x405   :  { %v440_v59 = vrot.slane %v439_v58, 2  ;;  %v435_v60 = vrot.slane %v434_v46, 1 }
 0x407   :  { %v441_v61 = vadd.f32 %v440_v59, %v439_v58  ;;  %v436_v14 = vadd.f32 %v435_v60, %v434_v46 }
 0x409   :  { %v442_v62 = vrot.slane %v441_v61, 1 }
 0x40b   :  { %v443_v63 = vadd.f32 %v442_v62, %v441_v61 }
 0x40d   :  { %v446_v0 = vsel %vm161_vm2, %v443_v63, %v436_v14 }
 0x40e   :  { %449 = vst.msk [vmem:[#allocation7] sm:$0x3] %vm448_vm8, %v446_v0 }
 0x40f   :  { %575 = shalt.err (!%p572_p6)
}
 0x410   :  { %s576_s16 = scalar_lea.hbm %s742_s6, 32 }
 0x411   :  { %p577_p7 = scmp.ne.s32.totalorder %s742_s6, %s576_s16  ;;  %p580_p8 = scmp.lt.u32.totalorder %s576_s16, %s742_s6 }
 0x413   :  { %p582_p9 = pnand %p580_p8, %p577_p7 }
 0x415   :  { %585 = shalt.err (!%p582_p9)
}
 0x416   :  { %459 = dma.vmem_to_hbm [thread:$0]  %s457_s12, 32, %s742_s6, [#allocation4]  }
 0x417   :  { %590 = dma.done.wait [#allocation4], 32  }
 0x418   :  { %591 = vsyncadd [#allocation4], 4294967264 }
 0x419   :  { %463 = vsyncpa [#allocation3], 1 }
 0x41a   :  { %464 = vsyncpa [#allocation6], 1 }
 0x41b   :  { %465 = vsyncpa [#allocation4], 1 }

</bundles_post_ra>
